<compile_context>
chip_gen: v5e
topology: v5e:2x2
jax: 0.10.0
libtpu: 0.0.40
codegen_flags: <defaults>
</compile_context>

<pallas_src>
import jax
import jax.numpy as jnp
from jax.experimental import pallas as pl
from jax.experimental.pallas import tpu as pltpu

_LANES = 128
_SUBLANES = 8
# Per-block byte budget: 2 MiB per buffer.  With double-buffered input and
# output that is <= 8 MiB of scoped VMEM -- comfortably inside every
# generation's default (v5e 16 MiB, v6e/v7x 32 MiB).
_TARGET_BLOCK_BYTES = 2 * 1024 * 1024
_SINGLE_BLOCK_BYTES = _TARGET_BLOCK_BYTES


def _sigmoid_kernel(x_ref, o_ref):
    # Exact sigmoid in f32: the kernel is memory-bound, so the divide is free;
    # f32-internal math also keeps bf16 inputs accurate and v5e-compatible.
    x = x_ref[...].astype(jnp.float32)
    o_ref[...] = (1.0 / (1.0 + jnp.exp(-x))).astype(o_ref.dtype)


def _sigmoid_2d(x2d, block_rows):
    rows, width = x2d.shape
    grid = (pl.cdiv(rows, block_rows),)
    return pl.pallas_call(
        _sigmoid_kernel,
        out_shape=jax.ShapeDtypeStruct((rows, width), x2d.dtype),
        grid_spec=pltpu.PrefetchScalarGridSpec(
            num_scalar_prefetch=0,
            grid=grid,
            in_specs=[pl.BlockSpec((block_rows, width), lambda i: (i, 0))],
            out_specs=pl.BlockSpec((block_rows, width), lambda i: (i, 0)),
        ),
        compiler_params=pltpu.CompilerParams(
            dimension_semantics=("parallel",),
        ),
    )(x2d)


def tudui_forward(x):
    """Forward pass of `Tudui`: elementwise Sigmoid on an NCHW tensor."""
    orig_shape = x.shape
    n_elems = x.size
    itemsize = jnp.dtype(x.dtype).itemsize
    total_bytes = n_elems * itemsize

    if n_elems % _LANES == 0:
        # Common case: pick the widest lane-dense slab width that divides the
        # element count.  Pure reshape -> no extra HBM passes.
        width = _LANES
        for cand in (2048, 1024, 512, 256):
            if n_elems % cand == 0:
                width = cand
                break
        rows = n_elems // width
        x2d = x.reshape(rows, width)

        if total_bytes <= _SINGLE_BLOCK_BYTES:
            # Tiny-input fast path: single grid step, full-array block.
            out2d = _sigmoid_2d(x2d, rows)
        else:
            bytes_per_row = width * itemsize
            block_rows = (_TARGET_BLOCK_BYTES // bytes_per_row) // _SUBLANES * _SUBLANES
            block_rows = max(_SUBLANES, block_rows)
            out2d = _sigmoid_2d(x2d, block_rows)
        return out2d.reshape(orig_shape)

    # Ragged fallback (element count not a multiple of 128): pad the flat
    # buffer up to a multiple of 8*128, run, slice off the tail.  This path is
    # rare for NCHW activations and keeps correctness for awkward sizes.
    tile_elems = _SUBLANES * _LANES
    padded = pl.cdiv(n_elems, tile_elems) * tile_elems
    x_flat = jnp.pad(jnp.ravel(x), (0, padded - n_elems))
    rows = padded // _LANES
    bytes_per_row = _LANES * itemsize
    block_rows = (_TARGET_BLOCK_BYTES // bytes_per_row) // _SUBLANES * _SUBLANES
    block_rows = max(_SUBLANES, min(rows, block_rows))
    out2d = _sigmoid_2d(x_flat.reshape(rows, _LANES), block_rows)
    return out2d.reshape(-1)[:n_elems].reshape(orig_shape)


if __name__ == "__main__":
    key = jax.random.PRNGKey(0)
    # NCHW input, small shapes consistent with the module's elementwise forward.
    x = jax.random.normal(key, (2, 4, 16, 16), dtype=jnp.float32)

    y = tudui_forward(x)
    jax.block_until_ready(y)

    # Sanity check against plain JAX sigmoid.
    ref = jax.nn.sigmoid(x)
    assert y.shape == x.shape and y.dtype == x.dtype
    assert jnp.allclose(y, ref, atol=1e-6, rtol=1e-6)

    print("KERNEL_OK")
</pallas_src>

<mosaic_0001>
module attributes {stable_mosaic.version = 11 : i64} {
  func.func @_sigmoid_kernel(%arg0: i32, %arg1: memref<1x2048xf32, #tpu.memory_space<vmem>>, %arg2: memref<1x2048xf32, #tpu.memory_space<vmem>>) attributes {dimension_semantics = [#tpu.dimension_semantics<parallel>], iteration_bounds = array<i64: 1>, scalar_prefetch = 0 : i64, scratch_operands = 0 : i64, tpu.core_type = #tpu.core_type<tc>, window_params = [{transform_indices = @transform_0, window_bounds = array<i64: 1, 2048>}, {transform_indices = @transform_1, window_bounds = array<i64: 1, 2048>}]} {
    %c0 = arith.constant 0 : index
    %c0_0 = arith.constant 0 : index
    %0 = vector.load %arg1[%c0, %c0_0] : memref<1x2048xf32, #tpu.memory_space<vmem>>, vector<1x2048xf32>
    %cst = arith.constant 0.000000e+00 : f32
    %1 = vector.broadcast %cst : f32 to vector<1x2048xf32>
    %2 = arith.subf %1, %0 : vector<1x2048xf32>
    %3 = math.exp %2 : vector<1x2048xf32>
    %cst_1 = arith.constant 1.000000e+00 : f32
    %4 = vector.broadcast %cst_1 : f32 to vector<1x2048xf32>
    %5 = arith.addf %4, %3 : vector<1x2048xf32>
    %cst_2 = arith.constant 1.000000e+00 : f32
    %6 = vector.broadcast %cst_2 : f32 to vector<1x2048xf32>
    %7 = arith.divf %6, %5 : vector<1x2048xf32>
    %c0_3 = arith.constant 0 : index
    %c0_4 = arith.constant 0 : index
    %8 = vector.load %arg2[%c0_3, %c0_4] : memref<1x2048xf32, #tpu.memory_space<vmem>>, vector<1x2048xf32>
    tpu.vector_store %arg2[%c0_3, %c0_4], %7 {strides = array<i32>} : memref<1x2048xf32, #tpu.memory_space<vmem>>, vector<1x2048xf32>,
    return
  }
  func.func @transform_0(%arg0: i32) -> (i32, i32) {
    %c0_i32 = arith.constant 0 : i32
    %c0_i32_0 = arith.constant 0 : i32
    return %arg0, %c0_i32 : i32, i32
  }
  func.func @transform_1(%arg0: i32) -> (i32, i32) {
    %c0_i32 = arith.constant 0 : i32
    %c0_i32_0 = arith.constant 0 : i32
    return %arg0, %c0_i32 : i32, i32
  }
}

</mosaic_0001>

<bundles_post_ra>
// kernel: tpu_custom_call.1
= control target key start
LH: loop header
LB: loop body
LE: loop exit
PB: predicated region body
PF: predicated region fallthrough
CT: control target
= control target key end

     0   :  { %6 = vsyncpa [#allocation3], 0  ;;  %s162_s0 = inlined_call_operand.hbm [shape: f32[1,2048], index: 0, kind: input, shape index: {}]   ;;  %s163_s1 = inlined_call_operand.hbm [shape: f32[1,2048], index: 1, kind: output, shape index: {}]  }
   0x1   :  { %7 = vsyncpa [#allocation4], 0  ;;  %s13_s8 = sshll.u32 %s162_s0, 4  ;;  %s144_s9 = smov [#allocation2]   ;;  %s14_s8 = int_to_ptr.hbm [resolvable:$true] %s13_s8 }
   0x2   :  { %s15_s10 = sshll.u32 %s144_s9, 4  ;;  %s16_s10 = int_to_ptr.vmem [resolvable:$true] %s15_s10 }
   0x3   :  { %18 = dma.hbm_to_vmem [thread:$0]  %s14_s8, 256, %s16_s10, [#allocation3]  }
   0x4   :  { %140 = dma.done.wait [#allocation3], 256  }
   0x5   :  { %141 = vsyncadd [#allocation3], 4294967040  ;;  %v23_v0 = vld [vmem:[#allocation2] sm:$0xff]  ;;  %v24_v1 = vld [vmem:[#allocation2 + $0x8] sm:$0xff]  ;;  %s145_s0 = smov [#allocation5]   ;;  %s72_s14 = sshll.u32 %s163_s1, 4  ;;  %s73_s14 = int_to_ptr.hbm [resolvable:$true] %s72_s14 }
   0x6   :  { %v25_v2 = vsub.f32 0.0, %v23_v0  ;;  %v26_v3 = vsub.f32 0.0, %v24_v1  ;;  %s70_s11 = sshll.u32 %s145_s0, 4  ;;  %s71_s11 = int_to_ptr.vmem [resolvable:$true] %s70_s11 }
   0x8   :  { %v27_v4 = vmul.f32 1.442695, %v25_v2  ;;  %v29_v5 = vmul.f32 1.442695, %v26_v3 }
   0xa   :  { %84 = vpow2.f32 %v27_v4 }
   0xb   :  { %86 = vpow2.f32 %v29_v5 }
  0x10   :  { %v85_v6 = vpop.eup %84 }
  0x11   :  { %v87_v7 = vpop.eup %86  ;;  %v31_v8 = vadd.f32 1.0, %v85_v6 }
  0x12   :  { %v32_v9 = vadd.f32 1.0, %v87_v7 }
  0x13   :  { %88 = vrcp.f32 %v31_v8  ;;  %vm38_vm0 = vweird.f32 %v31_v8  ;;  %v44_v13 = vand.u32 2147483648, %v31_v8  ;;  %v42_v16 = vand.u32 2147483647, %v31_v8 }
  0x14   :  { %90 = vrcp.f32 %v32_v9  ;;  %v59_v17 = vand.u32 2147483648, %v32_v9  ;;  %vm53_vm2 = vweird.f32 %v32_v9  ;;  %v57_v19 = vand.u32 2147483647, %v32_v9 }
  0x15   :  { %v45_v21 = vor.u32 1.1754944e-38, %v44_v13  ;;  %vm43_vm5 = vcmp.eq.f32.partialorder %v42_v16, 8.507059e+37 }
  0x16   :  { %v60_v24 = vor.u32 1.1754944e-38, %v59_v17  ;;  %vm58_vm7 = vcmp.eq.f32.partialorder %v57_v19, 8.507059e+37 }
  0x19   :  { %v89_v10 = vpop.eup %88 }
  0x1a   :  { %v91_v11 = vpop.eup %90  ;;  %v34_v12 = vmul.f32 %v89_v10, %v31_v8  ;;  %vm39_vm1 = vweird.f32 %v89_v10 }
  0x1b   :  { %v49_v14 = vmul.f32 %v91_v11, %v32_v9  ;;  %vm54_vm3 = vweird.f32 %v91_v11  ;;  %vm40_vm4 = vmor %vm38_vm0, %vm39_vm1 }
  0x1c   :  { %v35_v15 = vsub.f32 1.0, %v34_v12  ;;  %vm55_vm6 = vmor %vm53_vm2, %vm54_vm3 }
  0x1d   :  { %v50_v18 = vsub.f32 1.0, %v49_v14 }
  0x1e   :  { %v36_v20 = vmul.f32 %v89_v10, %v35_v15 }
  0x1f   :  { %v51_v22 = vmul.f32 %v91_v11, %v50_v18 }
  0x20   :  { %v37_v23 = vadd.f32 %v89_v10, %v36_v20 }
  0x21   :  { %v52_v25 = vadd.f32 %v91_v11, %v51_v22 }
  0x22   :  { %v41_v26 = vsel %vm40_vm4, %v89_v10, %v37_v23 }
  0x23   :  { %v46_v27 = vsel %vm43_vm5, %v45_v21, %v41_v26  ;;  %v56_v28 = vsel %vm55_vm6, %v91_v11, %v52_v25 }
  0x24   :  { %63 = vst [vmem:[#allocation5] sm:$0xff] %v46_v27  ;;  %v61_v29 = vsel %vm58_vm7, %v60_v24, %v56_v28 }
  0x25   :  { %64 = vst [vmem:[#allocation5 + $0x8] sm:$0xff] %v61_v29 }
  0x26   :  { %75 = dma.vmem_to_hbm [thread:$0]  %s71_s11, 256, %s73_s14, [#allocation4]  }
  0x27   :  { %142 = dma.done.wait [#allocation4], 256  }
  0x28   :  { %143 = vsyncadd [#allocation4], 4294967040 }
  0x29   :  { %80 = vsyncpa [#allocation3], 1 }
  0x2a   :  { %81 = vsyncpa [#allocation4], 1 }

</bundles_post_ra>
